<compile_context>
chip_gen: v6e
topology: v6e:2x2x1
jax: 0.10.0
libtpu: 0.0.40
codegen_flags: <defaults>
</compile_context>

<pallas_src>
import functools
import math

import jax
import jax.numpy as jnp
from jax import lax
from jax.experimental import pallas as pl
from jax.experimental.pallas import tpu as pltpu


def _mlp_critic_kernel(x_ref, w1_ref, b1_ref, w2_ref, b2_ref, w3_ref, b3_ref,
                       o_ref, *, fc3_elementwise):
    """One batch tile of the critic MLP, batch-on-lanes layout.

    x_ref : [TILE_B, input_dim]   input dtype (streamed, pipelined)
    w1    : [hidden, input_dim]   compute dtype (PyTorch nn.Linear layout)
    w2    : [hidden, hidden]      compute dtype
    w3    : [hidden, out_dim]     compute dtype (pre-transposed in wrapper)
    b*    : [*, 1]                f32 (bias/ReLU epilogues stay f32 on VPU)
    o_ref : [out_dim, TILE_B]     f32 (lane-dense even for out_dim == 1)
    """
    # Cast x in-kernel (no wrapper HBM pass); no-op when dtypes match.
    x = x_ref[...].astype(w1_ref.dtype)

    # fc1 + ReLU: contract on features (trans_b) -> lane-dense [H, TILE_B].
    h = lax.dot_general(w1_ref[...], x,
                        dimension_numbers=(((1,), (1,)), ((), ())),
                        preferred_element_type=jnp.float32)
    h = jnp.maximum(h + b1_ref[...], 0.0)

    # fc2 + ReLU.
    h = jnp.dot(w2_ref[...], h.astype(w2_ref.dtype),
                preferred_element_type=jnp.float32)
    h = jnp.maximum(h + b2_ref[...], 0.0)

    # fc3 (+ bias folded in).
    if fc3_elementwise:
        # out_dim == 1: skip an M=1 MXU pass; VPU multiply + XLU sublane sum.
        q = jnp.sum(h * w3_ref[...], axis=0, keepdims=True)      # [1, TILE_B]
    else:
        q = lax.dot_general(w3_ref[...], h.astype(w3_ref.dtype),
                            dimension_numbers=(((0,), (0,)), ((), ())),
                            preferred_element_type=jnp.float32)  # [O, TILE_B]
    o_ref[...] = (q + b3_ref[...]).astype(o_ref.dtype)


def _pick_tile_b(batch, cap=2048):
    """Multiple of 128, large enough to amortize per-step overhead, but
    >= 2 grid steps when possible so v7x's two TensorCores split the batch."""
    half = -(-batch // 2)                 # cdiv(batch, 2)
    tile = -(-half // 128) * 128          # round up to 128
    return max(128, min(cap, tile))


def mlp_critic_forward(x, params, *, tile_b=None, compute_dtype=None):
    """x: [B, input_dim]. params: PyTorch nn.Linear-layout weights/biases."""
    w1, b1 = params["w1"], params["b1"]
    w2, b2 = params["w2"], params["b2"]
    w3, b3 = params["w3"], params["b3"]

    B, input_dim = x.shape
    out_dim = w3.shape[0]

    if compute_dtype is None:
        compute_dtype = x.dtype           # no extra cast pass over x
    if tile_b is None:
        tile_b = _pick_tile_b(B)
    else:
        tile_b = max(128, (tile_b // 128) * 128)
    grid = (pl.cdiv(B, tile_b),)

    # Tiny, VMEM-resident operands (cast/transpose here is negligible).
    w1c = w1.astype(compute_dtype)
    w2c = w2.astype(compute_dtype)
    w3c = w3.T.astype(compute_dtype)                  # [hidden, out_dim]
    b1c = b1.reshape(-1, 1).astype(jnp.float32)
    b2c = b2.reshape(-1, 1).astype(jnp.float32)
    b3c = b3.reshape(-1, 1).astype(jnp.float32)       # [out_dim, 1]

    # Weights/biases: same block every grid step -> DMA'd once, stay resident.
    resident = lambda a: pl.BlockSpec(a.shape, lambda i: (0,) * a.ndim)

    kernel = functools.partial(_mlp_critic_kernel,
                               fc3_elementwise=(out_dim == 1))

    out_t = pl.pallas_call(
        kernel,
        out_shape=jax.ShapeDtypeStruct((out_dim, B), jnp.float32),
        grid=grid,
        in_specs=[
            pl.BlockSpec((tile_b, input_dim), lambda i: (i, 0)),   # streamed x
            resident(w1c), resident(b1c),
            resident(w2c), resident(b2c),
            resident(w3c), resident(b3c),
        ],
        out_specs=pl.BlockSpec((out_dim, tile_b), lambda i: (0, i)),
        compiler_params=pltpu.CompilerParams(
            dimension_semantics=("parallel",),      # megacore / v7x 2-TC split
            vmem_limit_bytes=32 * 1024 * 1024,      # fits v5e/v6e/v7x
        ),
    )(x, w1c, b1c, w2c, b2c, w3c, b3c)

    # [out_dim, B] -> [B, out_dim]; trivial layout op on a tiny array.
    return out_t.T.astype(x.dtype)


def init_params(key, input_dim, hidden_dim=64, output_dim=1):
    """Xavier-uniform (gain=1) weights, zero biases — matches weights_init_.

    Weights stored in PyTorch nn.Linear layout: [out_features, in_features].
    """
    def xavier(k, fan_out, fan_in):
        bound = math.sqrt(6.0 / (fan_in + fan_out))
        return jax.random.uniform(k, (fan_out, fan_in), jnp.float32, -bound, bound)

    k1, k2, k3 = jax.random.split(key, 3)
    return {
        "w1": xavier(k1, hidden_dim, input_dim),
        "b1": jnp.zeros((hidden_dim,), jnp.float32),
        "w2": xavier(k2, hidden_dim, hidden_dim),
        "b2": jnp.zeros((hidden_dim,), jnp.float32),
        "w3": xavier(k3, output_dim, hidden_dim),
        "b3": jnp.zeros((output_dim,), jnp.float32),
    }


def reference_forward(x, params):
    p = lax.Precision.HIGHEST   # local precision only; no global config mutation
    h = jax.nn.relu(jnp.dot(x, params["w1"].T, precision=p) + params["b1"])
    h = jax.nn.relu(jnp.dot(h, params["w2"].T, precision=p) + params["b2"])
    return jnp.dot(h, params["w3"].T, precision=p) + params["b3"]


if __name__ == "__main__":
    key = jax.random.PRNGKey(0)
    k_x, k_p = jax.random.split(key)

    batch, input_dim, hidden_dim, output_dim = 200, 32, 64, 1
    x = jax.random.normal(k_x, (batch, input_dim), jnp.float32)
    params = init_params(k_p, input_dim, hidden_dim, output_dim)

    q_ref = reference_forward(x, params)

    # f32 path: auto tile_b (=128 here -> grid=(2,)), boundary-clipped last tile.
    fwd = jax.jit(mlp_critic_forward)
    q = jax.block_until_ready(fwd(x, params))
    assert q.shape == (batch, output_dim)
    assert jnp.allclose(q, q_ref, atol=1e-3, rtol=1e-3), "f32 kernel mismatch"

    # bf16 compute (cast happens inside the kernel; no extra HBM pass over x).
    fwd_bf16 = jax.jit(functools.partial(mlp_critic_forward,
                                         compute_dtype=jnp.bfloat16))
    q_bf16 = jax.block_until_ready(fwd_bf16(x, params))
    assert q_bf16.shape == (batch, output_dim)
    assert jnp.allclose(q_bf16, q_ref, atol=5e-2, rtol=5e-2), "bf16 kernel mismatch"

    # Single-step grid with a sub-128 batch (exercises boundary clipping alone).
    x_small = x[:64]
    q_small = jax.block_until_ready(fwd(x_small, params))
    assert jnp.allclose(q_small, reference_forward(x_small, params),
                        atol=1e-3, rtol=1e-3), "small-batch kernel mismatch"

    print("KERNEL_OK")
</pallas_src>

<mosaic_0001>
module attributes {stable_mosaic.version = 11 : i64} {
  func.func @_mlp_critic_kernel(%arg0: i32, %arg1: memref<128x32xf32, #tpu.memory_space<vmem>>, %arg2: memref<64x32xf32, #tpu.memory_space<vmem>>, %arg3: memref<64x1xf32, #tpu.memory_space<vmem>>, %arg4: memref<64x64xf32, #tpu.memory_space<vmem>>, %arg5: memref<64x1xf32, #tpu.memory_space<vmem>>, %arg6: memref<64x1xf32, #tpu.memory_space<vmem>>, %arg7: memref<1x1xf32, #tpu.memory_space<vmem>>, %arg8: memref<1x128xf32, #tpu.memory_space<vmem>>) attributes {dimension_semantics = [#tpu.dimension_semantics<parallel>], iteration_bounds = array<i64: 2>, scalar_prefetch = 0 : i64, scratch_operands = 0 : i64, tpu.core_type = #tpu.core_type<tc>, window_params = [{transform_indices = @transform_0, window_bounds = array<i64: 128, 32>}, {pipeline_mode = #tpu.pipeline_mode<synchronous>, transform_indices = @transform_1, window_bounds = array<i64: 64, 32>}, {pipeline_mode = #tpu.pipeline_mode<synchronous>, transform_indices = @transform_2, window_bounds = array<i64: 64, 1>}, {pipeline_mode = #tpu.pipeline_mode<synchronous>, transform_indices = @transform_3, window_bounds = array<i64: 64, 64>}, {pipeline_mode = #tpu.pipeline_mode<synchronous>, transform_indices = @transform_4, window_bounds = array<i64: 64, 1>}, {pipeline_mode = #tpu.pipeline_mode<synchronous>, transform_indices = @transform_5, window_bounds = array<i64: 64, 1>}, {pipeline_mode = #tpu.pipeline_mode<synchronous>, transform_indices = @transform_6, window_bounds = array<i64: 1, 1>}, {transform_indices = @transform_7, window_bounds = array<i64: 1, 128>}]} {
    %c0 = arith.constant 0 : index
    %c0_0 = arith.constant 0 : index
    %0 = vector.load %arg1[%c0, %c0_0] : memref<128x32xf32, #tpu.memory_space<vmem>>, vector<128x32xf32>
    %c0_1 = arith.constant 0 : index
    %c0_2 = arith.constant 0 : index
    %1 = vector.load %arg2[%c0_1, %c0_2] : memref<64x32xf32, #tpu.memory_space<vmem>>, vector<64x32xf32>
    %cst = arith.constant dense<0.000000e+00> : vector<64x128xf32>
    %2 = tpu.matmul %1, %0, %cst {dimension_numbers = #tpu.dot_dimension_numbers<[1], [1], [0], [0], [0, 0, 1, 0], [], []>} : vector<64x32xf32>, vector<128x32xf32>, vector<64x128xf32> -> vector<64x128xf32>
    %c0_3 = arith.constant 0 : index
    %c0_4 = arith.constant 0 : index
    %3 = vector.load %arg3[%c0_3, %c0_4] : memref<64x1xf32, #tpu.memory_space<vmem>>, vector<64x1xf32>
    %4 = vector.broadcast %3 : vector<64x1xf32> to vector<64x128xf32>
    %5 = arith.addf %2, %4 : vector<64x128xf32>
    %cst_5 = arith.constant 0.000000e+00 : f32
    %6 = vector.broadcast %cst_5 : f32 to vector<64x128xf32>
    %7 = arith.maximumf %5, %6 : vector<64x128xf32>
    %c0_6 = arith.constant 0 : index
    %c0_7 = arith.constant 0 : index
    %8 = vector.load %arg4[%c0_6, %c0_7] : memref<64x64xf32, #tpu.memory_space<vmem>>, vector<64x64xf32>
    %cst_8 = arith.constant dense<0.000000e+00> : vector<64x128xf32>
    %9 = tpu.matmul %8, %7, %cst_8 {dimension_numbers = #tpu.dot_dimension_numbers<[1], [0], [0], [1], [0, 0, 1, 1], [], []>} : vector<64x64xf32>, vector<64x128xf32>, vector<64x128xf32> -> vector<64x128xf32>
    %c0_9 = arith.constant 0 : index
    %c0_10 = arith.constant 0 : index
    %10 = vector.load %arg5[%c0_9, %c0_10] : memref<64x1xf32, #tpu.memory_space<vmem>>, vector<64x1xf32>
    %11 = vector.broadcast %10 : vector<64x1xf32> to vector<64x128xf32>
    %12 = arith.addf %9, %11 : vector<64x128xf32>
    %cst_11 = arith.constant 0.000000e+00 : f32
    %13 = vector.broadcast %cst_11 : f32 to vector<64x128xf32>
    %14 = arith.maximumf %12, %13 : vector<64x128xf32>
    %c0_12 = arith.constant 0 : index
    %c0_13 = arith.constant 0 : index
    %15 = vector.load %arg6[%c0_12, %c0_13] : memref<64x1xf32, #tpu.memory_space<vmem>>, vector<64x1xf32>
    %16 = vector.broadcast %15 : vector<64x1xf32> to vector<64x128xf32>
    %17 = arith.mulf %14, %16 : vector<64x128xf32>
    %cst_14 = arith.constant dense<0.000000e+00> : vector<128xf32>
    %18 = vector.multi_reduction <add>, %17, %cst_14 [0] : vector<64x128xf32> to vector<128xf32>
    %19 = vector.shape_cast %18 : vector<128xf32> to vector<1x128xf32>
    %c0_15 = arith.constant 0 : index
    %c0_16 = arith.constant 0 : index
    %20 = vector.load %arg7[%c0_15, %c0_16] : memref<1x1xf32, #tpu.memory_space<vmem>>, vector<1x1xf32>
    %21 = vector.broadcast %20 : vector<1x1xf32> to vector<1x128xf32>
    %22 = arith.addf %19, %21 : vector<1x128xf32>
    %c0_17 = arith.constant 0 : index
    %c0_18 = arith.constant 0 : index
    %23 = vector.load %arg8[%c0_17, %c0_18] : memref<1x128xf32, #tpu.memory_space<vmem>>, vector<1x128xf32>
    tpu.vector_store %arg8[%c0_17, %c0_18], %22 {strides = array<i32>} : memref<1x128xf32, #tpu.memory_space<vmem>>, vector<1x128xf32>,
    return
  }
  func.func @transform_0(%arg0: i32) -> (i32, i32) {
    %c0_i32 = arith.constant 0 : i32
    %c0_i32_0 = arith.constant 0 : i32
    return %arg0, %c0_i32 : i32, i32
  }
  func.func @transform_1(%arg0: i32) -> (i32, i32) {
    %c0_i32 = arith.constant 0 : i32
    %c0_i32_0 = arith.constant 0 : i32
    %c0_i32_1 = arith.constant 0 : i32
    return %c0_i32, %c0_i32_0 : i32, i32
  }
  func.func @transform_2(%arg0: i32) -> (i32, i32) {
    %c0_i32 = arith.constant 0 : i32
    %c0_i32_0 = arith.constant 0 : i32
    %c0_i32_1 = arith.constant 0 : i32
    return %c0_i32, %c0_i32_0 : i32, i32
  }
  func.func @transform_3(%arg0: i32) -> (i32, i32) {
    %c0_i32 = arith.constant 0 : i32
    %c0_i32_0 = arith.constant 0 : i32
    %c0_i32_1 = arith.constant 0 : i32
    return %c0_i32, %c0_i32_0 : i32, i32
  }
  func.func @transform_4(%arg0: i32) -> (i32, i32) {
    %c0_i32 = arith.constant 0 : i32
    %c0_i32_0 = arith.constant 0 : i32
    %c0_i32_1 = arith.constant 0 : i32
    return %c0_i32, %c0_i32_0 : i32, i32
  }
  func.func @transform_5(%arg0: i32) -> (i32, i32) {
    %c0_i32 = arith.constant 0 : i32
    %c0_i32_0 = arith.constant 0 : i32
    %c0_i32_1 = arith.constant 0 : i32
    return %c0_i32, %c0_i32_0 : i32, i32
  }
  func.func @transform_6(%arg0: i32) -> (i32, i32) {
    %c0_i32 = arith.constant 0 : i32
    %c0_i32_0 = arith.constant 0 : i32
    %c0_i32_1 = arith.constant 0 : i32
    return %c0_i32, %c0_i32_0 : i32, i32
  }
  func.func @transform_7(%arg0: i32) -> (i32, i32) {
    %c0_i32 = arith.constant 0 : i32
    %c0_i32_0 = arith.constant 0 : i32
    return %c0_i32, %arg0 : i32, i32
  }
}

</mosaic_0001>

<bundles_post_ra>
// kernel: mlp_critic_forward.1
= control target key start
LH: loop header
LB: loop body
LE: loop exit
PB: predicated region body
PF: predicated region fallthrough
CT: control target
= control target key end

     0   :  { %s1475_s0 = inlined_call_operand.vmem [shape: f32[200,32], index: 0, kind: input, shape index: {}]   ;;  %s1476_s1 = inlined_call_operand.vmem [shape: f32[64,32], index: 1, kind: input, shape index: {}]   ;;  %s1477_s2 = inlined_call_operand.vmem [shape: f32[64,1], index: 2, kind: input, shape index: {}]   ;;  %s1478_s3 = inlined_call_operand.vmem [shape: f32[64,64], index: 3, kind: input, shape index: {}]   ;;  %s1479_s4 = inlined_call_operand.vmem [shape: f32[64,1], index: 4, kind: input, shape index: {}]   ;;  %s1480_s5 = inlined_call_operand.vmem [shape: f32[64,1], index: 5, kind: input, shape index: {}]   ;;  %s1481_s6 = inlined_call_operand.<no memory space> [shape: f32[1,1], index: 6, kind: input, shape index: {}]   ;;  %s1482_s7 = inlined_call_operand.hbm [shape: f32[1,200], index: 7, kind: output, shape index: {}]  }
   0x1   :  { %v12_v0 = vstv %s1481_s6 }
   0x2   :  { %13 = vst [vmem:[#allocation2] sm:$0x1] %v12_v0 }
   0x3   :  { %14 = vsyncpa [#allocation4], 0 }
   0x4   :  { %16 = vsyncpa [#allocation4 + $0x1], 0  ;;  %s1203_s26 = smov 0   ;;  %s1205_s27 = smov 0  }
   0x5   :  { %s1207_s28 = smov 0   ;;  %s1209_s29 = smov 0  }
   0x6 LB: > { %s900_s6 = sadd.s32 4294967295, %s1156_s29   ;;  %s901_s30 = sadd.s32 4294967294, %s1156_s29   ;;  %s1156_s29 = sphi %s1209_s29, %s1488_s29   ;;  %s1152_s28 = sphi %s1207_s28, %s1487_s28   ;;  %s1148_s27 = sphi %s1205_s27, %s1486_s27   ;;  %s1144_s26 = sphi %s1203_s26, %s1485_s26  }
   0x7   : > { %s1226_s8 = sadd.s32 1, %s1156_s29   ;;  %s181_s9 = sadd.s32 1, %s1152_s28 }
   0x8   : > { %s178_s10 = ssub.s32 %s1156_s29, %s1226_s8  ;;  %p191_p0 = scmp.ne.s32.totalorder %s1152_s28, %s1148_s27 }
   0x9   : > { %p179_p1 = scmp.eq.s32.totalorder %s178_s10, 0  ;;  %p192_p2 = scmp.eq.s32.totalorder %s900_s6, 1 }
   0xa   : > { %p197_p3 = scmp.ne.s32.totalorder %s1148_s27, %s1144_s26  ;;  %p198_p4 = scmp.eq.s32.totalorder %s901_s30, 1 }
   0xb   : > { %s1236_s11 = scalar_select %p179_p1, %s1152_s28, %s181_s9  }
   0xc   : > { %p1238_p5 = por %p192_p2, %p191_p0  ;;  %p1242_p6 = por %p198_p4, %p197_p3 }
   0xd   : > { %p904_p7 = scmp.ge.s32.totalorder %s1156_s29, 1  ;;  %p251_p8 = scmp.lt.s32.totalorder %s1156_s29, 3 }
   0xf   : > { %p252_p9 = pnand %p904_p7, %p251_p8 }
  0x10   : > { %s1248_s14 = sshll.u32 (!%p252_p9), %s900_s6, 4  ;;  %s284_s30 = sand.u32 (!%p252_p9), 1, %s1148_s27  }
  0x11   : > { %255 = sbr.rel (%p252_p9) target bundleno = 560 (0x230), region = 48  ;;  %p291_p10 = scmp.lt.s32.totalorder (!%p252_p9), %s1248_s14, 24 }
  0x12   : > { %s285_s9 = scalar_lea.vmem (!%p252_p9), [#allocation3], %s284_s30  ;;  %s834_s18 = scalar_lea.sflag (!%p252_p9), [#allocation4], %s284_s30 }
  0x13   : > { %s846_s15 = sshll.u32 (!%p252_p9), %s285_s9, 4  ;;  %s1159_s20 = smov (!%p252_p9), [#allocation3]   ;;  %s847_s15 = int_to_ptr.vmem [resolvable:$true] %s846_s15 }
  0x14   : > { %s1100_s21 = sshll.u32 (!%p252_p9), %s1159_s20, 4  ;;  %s1101_s21 = int_to_ptr.vmem [resolvable:$false] %s1100_s21 }
  0x15   : > { %s1102_s22 = scalar_lea.vmem (!%p252_p9), %s1101_s21, 32  ;;  %p1103_p0 = scmp.lt.s32.totalorder (!%p252_p9), %s847_s15, %s1101_s21 }
  0x16   : > { %vm372_vm0 = vcmask 261120   ;;  %v316_v1 = vld [vmem:[%s1476_s1] sm:$0xff]  ;;  %v1158_v2 = vmov 0   ;;  %v331_v3 = vld [vmem:[%s1477_s2 + $0x38] sm:$0xff]  ;;  %s292_s19 = scalar_select %p291_p10, %s1248_s14, 24  ;;  %v329_v4 = vld [vmem:[%s1477_s2 + $0x28] sm:$0xff] }
  0x17   : > { %1014 = vmatprep.mubr.msk.f32.mxu0 %vm372_vm0, %v316_v1  ;;  %1094 = vset.pattern.permute.xlu0 %v1158_v2  ;;  %v330_v5 = vld [vmem:[%s1477_s2 + $0x30] sm:$0xff]  ;;  %v328_v6 = vld [vmem:[%s1477_s2 + $0x20] sm:$0xff]  ;;  %v327_v9 = vld [vmem:[%s1477_s2 + $0x18] sm:$0xff]  ;;  %vm614_vm1 = vcmask 523264  }
  0x18   : > { %1095 = vset.pattern.permute.xlu1 %v1158_v2  ;;  %369 = vperm.xlu0 %1094, %v331_v3   ;;  %s906_s24 = sshll.u32 %s292_s19, 3  ;;  %v326_v10 = vld [vmem:[%s1477_s2 + $0x10] sm:$0xff]  ;;  %v325_v12 = vld [vmem:[%s1477_s2 + $0x8] sm:$0xff]  ;;  %v324_v13 = vld [vmem:[%s1477_s2] sm:$0xff]  ;;  %s1096_s19 = scalar_lea.vmem %s847_s15, 16 }
  0x19   : > { %359 = vperm.xlu1 %1095, %v329_v4   ;;  %s1271_s10 = scalar_lea.vmem %s1475_s0, %s906_s24  ;;  %v566_v15 = vld [vmem:[%s1479_s4] sm:$0xff]  ;;  %v567_v16 = vld [vmem:[%s1479_s4 + $0x8] sm:$0xff]  ;;  %v568_v18 = vld [vmem:[%s1479_s4 + $0x10] sm:$0xff]  ;;  %p1097_p11 = scmp.ne.s32.totalorder %s847_s15, %s1096_s19 }
  0x1a   : > { %v315_v7 = vld [vmem:[%s1271_s10 + $0x78] sm:$0xff]  ;;  %v314_v8 = vld [vmem:[%s1271_s10 + $0x70] sm:$0xff]  ;;  %v313_v11 = vld [vmem:[%s1271_s10 + $0x68] sm:$0xff]  ;;  %p1104_p1 = scmp.lt.s32.totalorder %s1102_s22, %s1096_s19 }
  0x1b   : > { %982 = vmatprep.subr.msk.mxu0 %vm372_vm0, %v315_v7  ;;  %v312_v14 = vld [vmem:[%s1271_s10 + $0x60] sm:$0xff]  ;;  %v311_v17 = vld [vmem:[%s1271_s10 + $0x58] sm:$0xff]  ;;  %v310_v20 = vld [vmem:[%s1271_s10 + $0x50] sm:$0xff]  ;;  %p1098_p12 = pnand %p1097_p11, %p1238_p5 }
  0x1c   : > { %364 = vperm.xlu0 %1094, %v330_v5   ;;  %983 = vmatpush3.xpose.msk.msra.mxu0 %vm372_vm0, %v315_v7  ;;  %v569_v19 = vld [vmem:[%s1479_s4 + $0x18] sm:$0xff]  ;;  %v752_v21 = vld [vmem:[%s1480_s5] sm:$0xff]  ;;  %v753_v22 = vld [vmem:[%s1480_s5 + $0x8] sm:$0xff]  ;;  %p1105_p2 = por %p1104_p1, %p1103_p0 }
  0x1d   : > { %354 = vperm.xlu1 %1095, %v328_v6   ;;  %984 = vmatprep.subr.msk.mxu0 %vm372_vm0, %v314_v8  ;;  %v309_v23 = vld [vmem:[%s1271_s10 + $0x48] sm:$0xff]  ;;  %v570_v24 = vld [vmem:[%s1479_s4 + $0x20] sm:$0xff]  ;;  %v754_v25 = vld [vmem:[%s1480_s5 + $0x10] sm:$0xff]  ;;  %p1099_p13 = pneg %p1098_p12 }
  0x1e   : > { %v308_v26 = vld [vmem:[%s1271_s10 + $0x40] sm:$0xff]  ;;  %v571_v27 = vld [vmem:[%s1479_s4 + $0x28] sm:$0xff]  ;;  %v755_v28 = vld [vmem:[%s1480_s5 + $0x18] sm:$0xff] }
  0x1f   : > { %v307_v29 = vld [vmem:[%s1271_s10 + $0x38] sm:$0xff]  ;;  %v572_v30 = vld [vmem:[%s1479_s4 + $0x30] sm:$0xff]  ;;  %v756_v31 = vld [vmem:[%s1480_s5 + $0x20] sm:$0xff]  ;;  %p1106_p3 = pnand %p1105_p2, %p1099_p13 }
  0x20   : > { %349 = vperm.xlu0 %1094, %v327_v9   ;;  %985 = vmatpush3.xpose.msk.msra.mxu0 %vm372_vm0, %v314_v8  ;;  %v306_v32 = vld [vmem:[%s1271_s10 + $0x30] sm:$0xff]  ;;  %v573_v33 = vld [vmem:[%s1479_s4 + $0x38] sm:$0xff]  ;;  %v757_v34 = vld [vmem:[%s1480_s5 + $0x28] sm:$0xff] }
  0x21   : > { %344 = vperm.xlu1 %1095, %v326_v10   ;;  %986 = vmatprep.subr.msk.mxu0 %vm372_vm0, %v313_v11  ;;  %v305_v35 = vld [vmem:[%s1271_s10 + $0x28] sm:$0xff]  ;;  %v758_v36 = vld [vmem:[%s1480_s5 + $0x30] sm:$0xff]  ;;  %v759_v37 = vld [vmem:[%s1480_s5 + $0x38] sm:$0xff] }
  0x22   : > { %v304_v38 = vld [vmem:[%s1271_s10 + $0x20] sm:$0xff]  ;;  %v303_v40 = vld [vmem:[%s1271_s10 + $0x18] sm:$0xff]  ;;  %v302_v41 = vld [vmem:[%s1271_s10 + $0x10] sm:$0xff] }
  0x23   : > { %v821_v39 = vld [vmem:[#allocation2] sm:$0x1]  ;;  %v301_v42 = vld [vmem:[%s1271_s10 + $0x8] sm:$0xff]  ;;  %v318_v45 = vld [vmem:[%s1476_s1 + $0x10] sm:$0xff] }
  0x24   : > { %339 = vperm.xlu0 %1094, %v325_v12   ;;  %987 = vmatpush3.xpose.msk.msra.mxu0 %vm372_vm0, %v313_v11  ;;  %v300_v43 = vld [vmem:[%s1271_s10] sm:$0xff]  ;;  %v317_v44 = vld [vmem:[%s1476_s1 + $0x8] sm:$0xff]  ;;  %v319_v46 = vld [vmem:[%s1476_s1 + $0x18] sm:$0xff]  ;;  %s844_s10 = scalar_lea.hbm %s1482_s7, %s1248_s14 }
  0x25   : > { %334 = vperm.xlu1 %1095, %v324_v13   ;;  %988 = vmatprep.subr.msk.mxu0 %vm372_vm0, %v312_v14  ;;  %v320_v47 = vld [vmem:[%s1476_s1 + $0x20] sm:$0xff]  ;;  %v321_v48 = vld [vmem:[%s1476_s1 + $0x28] sm:$0xff]  ;;  %v322_v49 = vld [vmem:[%s1476_s1 + $0x30] sm:$0xff] }
  0x26   : > { %v323_v50 = vld [vmem:[%s1476_s1 + $0x38] sm:$0xff]  ;;  %v558_v51 = vld [vmem:[%s1478_s3] sm:$0xff] }
  0x27   : > { %1042 = vmatprep.mubr.msk.f32.mxu1 %vm614_vm1, %v558_v51 }
  0x28   : > { %576 = vperm.xlu0 %1094, %v566_v15   ;;  %989 = vmatpush3.xpose.msk.msra.mxu0 %vm372_vm0, %v312_v14 }
  0x29   : > { %581 = vperm.xlu1 %1095, %v567_v16   ;;  %990 = vmatprep.subr.msk.mxu0 %vm372_vm0, %v311_v17 }
  0x2c   : > { %586 = vperm.xlu0 %1094, %v568_v18   ;;  %991 = vmatpush3.xpose.msk.msra.mxu0 %vm372_vm0, %v311_v17 }
  0x2d   : > { %591 = vperm.xlu1 %1095, %v569_v19   ;;  %992 = vmatprep.subr.msk.mxu0 %vm372_vm0, %v310_v20 }
  0x30   : > { %762 = vperm.xlu0 %1094, %v752_v21   ;;  %993 = vmatpush3.xpose.msk.msra.mxu0 %vm372_vm0, %v310_v20  ;;  %v559_v20 = vld [vmem:[%s1478_s3 + $0x8] sm:$0xff]  ;;  %v560_v21 = vld [vmem:[%s1478_s3 + $0x10] sm:$0xff] }
  0x31   : > { %767 = vperm.xlu1 %1095, %v753_v22   ;;  %994 = vmatprep.subr.msk.mxu0 %vm372_vm0, %v309_v23  ;;  %v561_v22 = vld [vmem:[%s1478_s3 + $0x18] sm:$0xff] }
  0x34   : > { %596 = vperm.xlu0 %1094, %v570_v24   ;;  %995 = vmatpush3.xpose.msk.msra.mxu0 %vm372_vm0, %v309_v23  ;;  %v562_v23 = vld [vmem:[%s1478_s3 + $0x20] sm:$0xff]  ;;  %v563_v24 = vld [vmem:[%s1478_s3 + $0x28] sm:$0xff] }
  0x35   : > { %772 = vperm.xlu1 %1095, %v754_v25   ;;  %996 = vmatprep.subr.msk.mxu0 %vm372_vm0, %v308_v26  ;;  %v564_v25 = vld [vmem:[%s1478_s3 + $0x30] sm:$0xff] }
  0x38   : > { %601 = vperm.xlu0 %1094, %v571_v27   ;;  %997 = vmatpush3.xpose.msk.msra.mxu0 %vm372_vm0, %v308_v26  ;;  %v565_v26 = vld [vmem:[%s1478_s3 + $0x38] sm:$0xff] }
  0x39   : > { %777 = vperm.xlu1 %1095, %v755_v28   ;;  %998 = vmatprep.subr.msk.mxu0 %vm372_vm0, %v307_v29 }
  0x3c   : > { %606 = vperm.xlu0 %1094, %v572_v30   ;;  %999 = vmatpush3.xpose.msk.msra.mxu0 %vm372_vm0, %v307_v29 }
  0x3d   : > { %782 = vperm.xlu1 %1095, %v756_v31   ;;  %1000 = vmatprep.subr.msk.mxu0 %vm372_vm0, %v306_v32 }
  0x40   : > { %611 = vperm.xlu0 %1094, %v573_v33   ;;  %1001 = vmatpush3.xpose.msk.msra.mxu0 %vm372_vm0, %v306_v32 }
  0x41   : > { %787 = vperm.xlu1 %1095, %v757_v34   ;;  %1002 = vmatprep.subr.msk.mxu0 %vm372_vm0, %v305_v35 }
  0x44   : > { %792 = vperm.xlu0 %1094, %v758_v36   ;;  %1003 = vmatpush3.xpose.msk.msra.mxu0 %vm372_vm0, %v305_v35 }
  0x45   : > { %797 = vperm.xlu1 %1095, %v759_v37   ;;  %1004 = vmatprep.subr.msk.mxu0 %vm372_vm0, %v304_v38 }
  0x48   : > { %824 = vperm.xlu0 %1094, %v821_v39   ;;  %1005 = vmatpush3.xpose.msk.msra.mxu0 %vm372_vm0, %v304_v38 }
  0x49   : > { %1006 = vmatprep.subr.msk.mxu0 %vm372_vm0, %v303_v40 }
  0x4c   : > { %1007 = vmatpush3.xpose.msk.msra.mxu0 %vm372_vm0, %v303_v40 }
  0x4d   : > { %1008 = vmatprep.subr.msk.mxu0 %vm372_vm0, %v302_v41 }
  0x50   : > { %1009 = vmatpush3.xpose.msk.msra.mxu0 %vm372_vm0, %v302_v41 }
  0x51   : > { %1010 = vmatprep.subr.msk.mxu0 %vm372_vm0, %v301_v42 }
  0x54   : > { %1011 = vmatpush3.xpose.msk.msra.mxu0 %vm372_vm0, %v301_v42 }
  0x55   : > { %1012 = vmatprep.subr.msk.mxu0 %vm372_vm0, %v300_v43 }
  0x58   : > { %1013 = vmatpush3.xpose.msk.msra.mxu0 %vm372_vm0, %v300_v43 }
  0x5b   : > { %1015 = vmatmul.mubr.msk.f32.vlgmr.msra.gmra.mxu0 %vm372_vm0, %v317_v44 }
  0x5c   : > { %1017 = vmatprep.mubr.msk.f32.mxu0 %vm372_vm0, %v318_v45 }
  0x5f   : > { %1018 = vmatmul.mubr.msk.f32.gmra.mxu0 %vm372_vm0, %v319_v46 }
  0x60   : > { %1020 = vmatprep.mubr.msk.f32.mxu0 %vm372_vm0, %v320_v47 }
  0x63   : > { %1021 = vmatmul.mubr.msk.f32.gmra.mxu0 %vm372_vm0, %v321_v48 }
  0x64   : > { %1023 = vmatprep.mubr.msk.f32.mxu0 %vm372_vm0, %v322_v49 }
  0x67   : > { %1024 = vmatmul.mubr.msk.f32.gmra.mxu0 %vm372_vm0, %v323_v50 }
  0x93   : > { %v370_v54 = vpop.permute.xlu0 %369 }
  0x94   : > { %v360_v56 = vpop.permute.xlu1 %359 }
  0x97   : > { %v365_v59 = vpop.permute.xlu0 %364 }
  0x98   : > { %v355_v61 = vpop.permute.xlu1 %354 }
  0x9b   : > { %v350_v4 = vpop.permute.xlu0 %349 }
  0x9c   : > { %v345_v7 = vpop.permute.xlu1 %344 }
  0x9f   : > { %v340_v12 = vpop.permute.xlu0 %339 }
  0xa0   : > { %v335_v15 = vpop.permute.xlu1 %334 }
  0xa3   : > { %v577_v27 = vpop.permute.xlu0 %576 }
  0xa4   : > { %v582_v28 = vpop.permute.xlu1 %581 }
  0xa7   : > { %v587_v29 = vpop.permute.xlu0 %586 }
  0xa8   : > { %v592_v30 = vpop.permute.xlu1 %591 }
  0xab   : > { %v763_v31 = vpop.permute.xlu0 %762 }
  0xac   : > { %v768_v32 = vpop.permute.xlu1 %767 }
  0xaf   : > { %v597_v33 = vpop.permute.xlu0 %596 }
  0xb0   : > { %v773_v34 = vpop.permute.xlu1 %772 }
  0xb3   : > { %v602_v35 = vpop.permute.xlu0 %601 }
  0xb4   : > { %v778_v38 = vpop.permute.xlu1 %777 }
  0xb7   : > { %v607_v45 = vpop.permute.xlu0 %606 }
  0xb8   : > { %v783_v49 = vpop.permute.xlu1 %782 }
 0x11b   : > { %v1016_v52 = vpop.f32.mrf.mxu0 }
 0x11c   : > { %v517_v13 = vadd.f32 %v1016_v52, %v340_v12 }
 0x11d   : > { %v511_v53 = vpop.f32.mrf.mxu0 }
 0x11e   : > { %v512_v16 = vadd.f32 %v511_v53, %v335_v15  ;;  %v551_v18 = vmax.f32 %v517_v13, 0.0 }
 0x11f   : > { %v1019_v55 = vpop.f32.mrf.mxu0 }
 0x120   : > { %v527_v8 = vadd.f32 %v1019_v55, %v350_v4  ;;  %v550_v19 = vmax.f32 %v512_v16, 0.0 }
 0x121   : > { %v521_v57 = vpop.f32.mrf.mxu0 }
 0x122   : > { %v522_v10 = vadd.f32 %v521_v57, %v345_v7  ;;  %v553_v14 = vmax.f32 %v527_v8, 0.0 }
 0x123   : > { %v1022_v58 = vpop.f32.mrf.mxu0 }
 0x124   : > { %v537_v1 = vadd.f32 %v1022_v58, %v360_v56  ;;  %v552_v17 = vmax.f32 %v522_v10, 0.0 }
 0x125   : > { %v531_v60 = vpop.f32.mrf.mxu0 }
 0x126   : > { %v532_v5 = vadd.f32 %v531_v60, %v355_v61  ;;  %v555_v9 = vmax.f32 %v537_v1, 0.0 }
 0x127   : > { %v1025_v62 = vpop.f32.mrf.mxu0 }
 0x128   : > { %v547_v63 = vadd.f32 %v1025_v62, %v370_v54  ;;  %v554_v11 = vmax.f32 %v532_v5, 0.0 }
 0x129   : > { %v541_v0 = vpop.f32.mrf.mxu0 }
 0x12a   : > { %v557_v2 = vmax.f32 %v547_v63, 0.0  ;;  %v542_v3 = vadd.f32 %v541_v0, %v365_v59  ;;  %v612_v59 = vpop.permute.xlu0 %611 }
 0x12c   : > { %v556_v6 = vmax.f32 %v542_v3, 0.0  ;;  %1026 = vmatprep.subr.mxu1 %v557_v2 }
 0x12d   : > { %1027 = vmatpush3.msra.mxu1 %v557_v2  ;;  %v788_v2 = vpop.permute.xlu1 %787 }
 0x12e   : > { %1028 = vmatprep.subr.mxu1 %v556_v6 }
 0x12f   : > { %1029 = vmatpush3.msra.mxu1 %v556_v6 }
 0x130   : > { %1030 = vmatprep.subr.mxu1 %v555_v9 }
 0x131   : > { %1031 = vmatpush3.msra.mxu1 %v555_v9 }
 0x132   : > { %1032 = vmatprep.subr.mxu1 %v554_v11 }
 0x133   : > { %1033 = vmatpush3.msra.mxu1 %v554_v11  ;;  %v793_v11 = vpop.permute.xlu0 %792 }
 0x134   : > { %1034 = vmatprep.subr.mxu1 %v553_v14 }
 0x135   : > { %1035 = vmatpush3.msra.mxu1 %v553_v14  ;;  %v798_v14 = vpop.permute.xlu1 %797 }
 0x136   : > { %1036 = vmatprep.subr.mxu1 %v552_v17 }
 0x137   : > { %1037 = vmatpush3.msra.mxu1 %v552_v17  ;;  %v827_v17 = vlaneseq }
 0x138   : > { %1038 = vmatprep.subr.mxu1 %v551_v18 }
 0x139   : > { %1039 = vmatpush3.msra.mxu1 %v551_v18 }
 0x13a   : > { %1040 = vmatprep.subr.mxu1 %v550_v19 }
 0x13b   : > { %1041 = vmatpush3.msra.mxu1 %v550_v19 }
 0x13c   : > { %1043 = vmatmul.mubr.msk.f32.vlgmr.msra.gmra.mxu1 %vm614_vm1, %v559_v20  ;;  %v828_v20 = vshrl.u32 %v827_v17, 7 }
 0x13d   : > { %1045 = vmatprep.mubr.msk.f32.mxu1 %vm614_vm1, %v560_v21 }
 0x140   : > { %1046 = vmatmul.mubr.msk.f32.gmra.mxu1 %vm614_vm1, %v561_v22 }
 0x141   : > { %1048 = vmatprep.mubr.msk.f32.mxu1 %vm614_vm1, %v562_v23  ;;  %v829_v23 = vsub.s32 0, %v828_v20 }
 0x144   : > { %1049 = vmatmul.mubr.msk.f32.gmra.mxu1 %vm614_vm1, %v563_v24 }
 0x145   : > { %1051 = vmatprep.mubr.msk.f32.mxu1 %vm614_vm1, %v564_v25  ;;  %v825_v25 = vpop.permute.xlu0 %824 }
 0x148   : > { %1052 = vmatmul.mubr.msk.f32.gmra.mxu1 %vm614_vm1, %v565_v26 }
 0x1fc   : > { %v1044_v36 = vpop.f32.mrf.mxu1 }
 0x1fd   : > { %v711_v37 = vadd.f32 %v1044_v36, %v582_v28 }
 0x1fe   : > { %v705_v39 = vpop.f32.mrf.mxu1 }
 0x1ff   : > { %v706_v40 = vadd.f32 %v705_v39, %v577_v27  ;;  %v745_v42 = vmax.f32 %v711_v37, 0.0  ;;  %v830_v27 = vrot.slane %v825_v25, %v829_v23 }
 0x200   : > { %v1047_v41 = vpop.f32.mrf.mxu1 }
 0x201   : > { %v744_v43 = vmax.f32 %v706_v40, 0.0  ;;  %v721_v44 = vadd.f32 %v1047_v41, %v592_v30  ;;  %v801_v52 = vmul.f32 %v768_v32, %v745_v42 }
 0x202   : > { %v715_v46 = vpop.f32.mrf.mxu1 }
 0x203   : > { %v800_v47 = vmul.f32 %v763_v31, %v744_v43  ;;  %v716_v48 = vadd.f32 %v715_v46, %v587_v29  ;;  %v747_v50 = vmax.f32 %v721_v44, 0.0 }
 0x204   : > { %v1050_v51 = vpop.f32.mrf.mxu1 }
 0x205   : > { %v746_v53 = vmax.f32 %v716_v48, 0.0  ;;  %v731_v54 = vadd.f32 %v1050_v51, %v602_v35  ;;  %v808_v56 = vadd.f32 %v801_v52, %v800_v47  ;;  %v803_v60 = vmul.f32 %v778_v38, %v747_v50 }
 0x206   : > { %v725_v55 = vpop.f32.mrf.mxu1 }
 0x207   : > { %v802_v57 = vmul.f32 %v773_v34, %v746_v53  ;;  %v726_v58 = vadd.f32 %v725_v55, %v597_v33  ;;  %v749_v63 = vmax.f32 %v731_v54, 0.0 }
 0x208   : > { %v1053_v61 = vpop.f32.mrf.mxu1 }
 0x209   : > { %v809_v62 = vadd.f32 %v808_v56, %v802_v57  ;;  %v748_v0 = vmax.f32 %v726_v58, 0.0  ;;  %v741_v1 = vadd.f32 %v1053_v61, %v612_v59  ;;  %v805_v7 = vmul.f32 %v788_v2, %v749_v63 }
 0x20a   : > { %v735_v3 = vpop.f32.mrf.mxu1 }
 0x20b   : > { %v804_v4 = vmul.f32 %v783_v49, %v748_v0  ;;  %v810_v5 = vadd.f32 %v809_v62, %v803_v60  ;;  %v736_v6 = vadd.f32 %v735_v3, %v607_v45  ;;  %v751_v9 = vmax.f32 %v741_v1, 0.0 }
 0x20d   : > { %v811_v8 = vadd.f32 %v810_v5, %v804_v4  ;;  %v750_v10 = vmax.f32 %v736_v6, 0.0  ;;  %v807_v15 = vmul.f32 %v798_v14, %v751_v9 }
 0x20f   : > { %v806_v12 = vmul.f32 %v793_v11, %v750_v10  ;;  %v812_v13 = vadd.f32 %v811_v8, %v805_v7 }
 0x211   : > { %v813_v16 = vadd.f32 %v812_v13, %v806_v12 }
 0x213   : > { %v814_v18 = vadd.f32 %v813_v16, %v807_v15 }
 0x215   : > { %v815_v19 = vrot.slane %v814_v18, 4 }
 0x217   : > { %v816_v21 = vadd.f32 %v815_v19, %v814_v18 }
 0x219   : > { %v817_v22 = vrot.slane %v816_v21, 2 }
 0x21b   : > { %v818_v24 = vadd.f32 %v817_v22, %v816_v21 }
 0x21d   : > { %v819_v26 = vrot.slane %v818_v24, 1 }
 0x21f   : > { %v820_v28 = vadd.f32 %v819_v26, %v818_v24 }
 0x221   : > { %v831_v29 = vadd.f32 %v830_v27, %v820_v28 }
 0x223   : > { %832 = vst [vmem:[%s285_s9] sm:$0x1] %v831_v29 }
 0x224   : > { %1109 = shalt.err (!%p1106_p3)
}
 0x225   : > { %s1110_s23 = scalar_lea.hbm %s844_s10, 16  ;;  %s1114_s25 = scalar_lea.hbm %s1482_s7, 32 }
 0x226   : > { %p1111_p4 = scmp.ne.s32.totalorder %s844_s10, %s1110_s23  ;;  %p1115_p9 = scmp.lt.s32.totalorder %s844_s10, %s1482_s7 }
 0x227   : > { %p1116_p10 = scmp.lt.s32.totalorder %s1114_s25, %s1110_s23 }
 0x228   : > { %p1112_p7 = pnand %p1111_p4, %p1238_p5 }
 0x229   : > { %p1117_p11 = por %p1116_p10, %p1115_p9 }
 0x22a   : > { %p1113_p8 = pneg %p1112_p7 }
 0x22c   : > { %p1118_p12 = pnand %p1117_p11, %p1113_p8 }
 0x22e   : > { %1121 = shalt.err (!%p1118_p12)
}
 0x22f   : > { %1054 = dma.vmem_to_hbm [thread:$0]  (%p1238_p5), %s847_s15, 16, %s844_s10, %s834_s18  }
 0x230 PF: > { %p1060_p13 = scmp.ge.s32.totalorder %s1156_s29, 2  ;;  %s858_s9 = sand.u32 1, %s1144_s26  }
 0x231   : > { %s859_s16 = scalar_lea.sflag [#allocation4], %s858_s9 }
 0x232   : > { %p1057_p0 = pnand %p1060_p13, %p1242_p6 }
 0x234   : > { %p1058_p1 = pneg %p1057_p0 }
 0x236   : > { %1139 = dma.done.wait (%p1058_p1), %s859_s16, 16  }
 0x237   : > { %1141 = vsyncadd (%p1058_p1), %s859_s16, 4294967280  ;;  %p19_p2 = scmp.ge.s32.totalorder %s1226_s8, 4   ;;  %s1485_s26 = smov %s1148_s27 }
 0x238   : > { %s1486_s27 = smov %s1152_s28  ;;  %s1487_s28 = smov %s1236_s11 }
 0x239   : > { %s1488_s29 = smov %s1226_s8  ;;  %21 = sbr.rel (!%p19_p2) target bundleno = 6 (0x6), region = 83 }
 0x23e   :  { %863 = vsyncpa [#allocation4], 1 }
 0x23f   :  { %865 = vsyncpa [#allocation4 + $0x1], 1 }

</bundles_post_ra>
